<compile_context>
chip_gen: v6e
topology: v6e:2x2x1
jax: 0.10.0
libtpu: 0.0.40
codegen_flags: <defaults>
</compile_context>

<pallas_src>
import functools

import jax
import jax.numpy as jnp
from jax import lax
from jax.experimental import pallas as pl
from jax.experimental.pallas import tpu as pltpu


def _accumulate(tile_ref, anchor_col, m_ref, s_ref, *, valid):
    """Fold one (tm, D) row tile into the running (max, sumexp) accumulators.

    `valid` is a static int: number of valid rows in this tile (tail tile),
    or None when every row is valid (no masking emitted).
    """
    # MXU matvec: (tm, D) @ (D, 1) -> (tm, 1), accumulated in f32.
    scores = jnp.dot(tile_ref[...], anchor_col,
                     preferred_element_type=jnp.float32)            # (tm, 1)
    if valid is not None:
        rows = lax.broadcasted_iota(jnp.int32, scores.shape, 0)
        scores = jnp.where(rows < valid, scores, -jnp.inf)
    tile_max = jnp.max(scores)
    new_m = jnp.maximum(m_ref[...], tile_max)                        # (1, 1)
    s_ref[...] = (s_ref[...] * jnp.exp(m_ref[...] - new_m)
                  + jnp.sum(jnp.exp(scores - new_m)))
    m_ref[...] = new_m


def _npair_kernel(anchor_ref, pos_ref, neg_ref, lse_a_ref, lse_b_ref,
                  m_a, s_a, m_b, s_b, *,
                  tp, tn, tiles_per_core, pos_tail_valid, neg_tail_valid):
    c = pl.program_id(0)                  # "core" / half of the tile list
    j = pl.program_id(1)                  # step within this half
    g = c * tiles_per_core + j            # global tile index

    @pl.when(j == 0)
    def _init():
        m_a[...] = jnp.full(m_a.shape, -jnp.inf, jnp.float32)
        s_a[...] = jnp.zeros_like(s_a)
        m_b[...] = jnp.full(m_b.shape, -jnp.inf, jnp.float32)
        s_b[...] = jnp.zeros_like(s_b)

    anchor_col = anchor_ref[...]          # (D, 1), native dtype

    pos_full = tp - (1 if pos_tail_valid else 0)   # unmasked positive tiles
    neg_full = tn - (1 if neg_tail_valid else 0)   # unmasked negative tiles

    if pos_full > 0:
        @pl.when(g < pos_full)
        def _pos_full():
            _accumulate(pos_ref, anchor_col, m_a, s_a, valid=None)

    if pos_tail_valid:
        @pl.when(g == tp - 1)
        def _pos_tail():
            _accumulate(pos_ref, anchor_col, m_a, s_a, valid=pos_tail_valid)

    if neg_full > 0:
        @pl.when(jnp.logical_and(g >= tp, g < tp + neg_full))
        def _neg_full():
            _accumulate(neg_ref, anchor_col, m_b, s_b, valid=None)

    if neg_tail_valid:
        @pl.when(g == tp + tn - 1)
        def _neg_tail():
            _accumulate(neg_ref, anchor_col, m_b, s_b, valid=neg_tail_valid)

    @pl.when(j == tiles_per_core - 1)
    def _finalize():
        # Per-core, per-stream log-sum-exp partials (-inf if this core saw no
        # tiles of that stream); merged stably in the wrapper.
        lse_a = jnp.where(s_a[...] > 0.0,
                          m_a[...] + jnp.log(s_a[...]), -jnp.inf)    # (1, 1)
        lse_b = jnp.where(s_b[...] > 0.0,
                          m_b[...] + jnp.log(s_b[...]), -jnp.inf)    # (1, 1)
        lse_a_ref[0] = jnp.broadcast_to(lse_a, lse_a_ref.shape[1:])
        lse_b_ref[0] = jnp.broadcast_to(lse_b, lse_b_ref.shape[1:])


def _vmem_capacity_bytes():
    try:
        cap = getattr(pltpu.get_tpu_info(), "vmem_capacity_bytes", None)
        if cap:
            return int(cap)
    except Exception:
        pass
    return 64 * 1024 * 1024       # conservative fallback (v7x-sized VMEM)


def _pick_tile_rows(n_rows, d, itemsize, target_bytes, max_rows=None):
    # Dtype-aware sublane rounding: 8 (f32), 16 (bf16), 32 (int8/fp8).
    sub = max(8, 32 // max(1, itemsize))
    rows = target_bytes // max(1, d * itemsize)
    if max_rows is not None:
        rows = min(rows, max_rows)
    rows = max(sub, (rows // sub) * sub)
    # A full-extent block is always layout-legal.
    return n_rows if n_rows <= rows else rows


def npair_loss(anchor, positives, negatives, *, max_tile_rows=None):
    """anchor (D,), positives (N_p, D), negatives (N_n, D) -> f32 scalar."""
    d = anchor.shape[-1]
    n_pos, n_neg = positives.shape[0], negatives.shape[0]
    anchor_col = anchor.reshape(d, 1)          # MXU-natural (K, N=1) RHS

    itemsize = jnp.dtype(positives.dtype).itemsize

    # Per-generation VMEM budget: 3/4 of physical, clamped to [32, 64] MiB.
    vmem_cap = _vmem_capacity_bytes()
    vmem_limit = max(32 * 1024 * 1024, min((vmem_cap * 3) // 4, 64 * 1024 * 1024))
    # Joint budget: 2 streams x 2 pipeline buffers x tile, plus headroom.
    stream_budget = vmem_limit - 4 * 1024 * 1024
    per_tile_target = min(stream_budget // 4, 12 * 1024 * 1024)

    tm_p = _pick_tile_rows(n_pos, d, itemsize, per_tile_target, max_tile_rows)
    tm_n = _pick_tile_rows(n_neg, d, itemsize, per_tile_target, max_tile_rows)
    tp = pl.cdiv(n_pos, tm_p)
    tn = pl.cdiv(n_neg, tm_n)
    pos_tail_valid = n_pos - (tp - 1) * tm_p if n_pos % tm_p else 0
    neg_tail_valid = n_neg - (tn - 1) * tm_n if n_neg % tm_n else 0

    num_cores = 2                              # v7x has 2 TCs; harmless on 1-TC parts
    total_tiles = tp + tn
    tiles_per_core = pl.cdiv(total_tiles, num_cores)

    kernel = functools.partial(
        _npair_kernel, tp=tp, tn=tn, tiles_per_core=tiles_per_core,
        pos_tail_valid=pos_tail_valid, neg_tail_valid=neg_tail_valid)

    def pos_index(c, j):
        return (jnp.clip(c * tiles_per_core + j, 0, tp - 1), 0)

    def neg_index(c, j):
        return (jnp.clip(c * tiles_per_core + j - tp, 0, tn - 1), 0)

    part_shape = (num_cores, 8, 128)
    lse_a_part, lse_b_part = pl.pallas_call(
        kernel,
        out_shape=(jax.ShapeDtypeStruct(part_shape, jnp.float32),
                   jax.ShapeDtypeStruct(part_shape, jnp.float32)),
        grid=(num_cores, tiles_per_core),
        in_specs=[
            # Anchor: resident across all steps.
            pl.BlockSpec((d, 1), lambda c, j: (0, 0)),
            # Positives: streamed while g < tp, parked otherwise (no re-DMA).
            pl.BlockSpec((tm_p, d), pos_index),
            # Negatives: parked at 0, streamed while tp <= g < tp + tn.
            pl.BlockSpec((tm_n, d), neg_index),
        ],
        out_specs=(
            pl.BlockSpec((1, 8, 128), lambda c, j: (c, 0, 0)),
            pl.BlockSpec((1, 8, 128), lambda c, j: (c, 0, 0)),
        ),
        scratch_shapes=[pltpu.VMEM((1, 1), jnp.float32)] * 4,  # m_a, s_a, m_b, s_b
        compiler_params=pltpu.CompilerParams(
            dimension_semantics=("parallel", "arbitrary"),
            vmem_limit_bytes=int(vmem_limit),
        ),
    )(anchor_col, positives, negatives)

    # Stable cross-core / cross-stream merge:
    #   loss = log(a + b) - log(a) = logaddexp(lse_a, lse_b) - lse_a
    lse_a = jnp.logaddexp(lse_a_part[0, 0, 0], lse_a_part[1, 0, 0])
    lse_b = jnp.logaddexp(lse_b_part[0, 0, 0], lse_b_part[1, 0, 0])
    return jnp.logaddexp(lse_a, lse_b) - lse_a


def _npair_loss_ref(anchor, positives, negatives):
    pos = (anchor[None, :] @ positives.T)[0]
    neg = (anchor[None, :] @ negatives.T)[0]
    a = jnp.sum(jnp.exp(pos))
    b = jnp.sum(jnp.exp(neg))
    return -jnp.log(a / (a + b))


if __name__ == "__main__":
    key = jax.random.PRNGKey(0)
    k1, k2, k3 = jax.random.split(key, 3)

    D, N_P, N_N = 32, 8, 12
    anchor = jax.random.normal(k1, (D,), dtype=jnp.float32) * 0.1
    positives = jax.random.normal(k2, (N_P, D), dtype=jnp.float32) * 0.1
    negatives = jax.random.normal(k3, (N_N, D), dtype=jnp.float32) * 0.1

    ref = _npair_loss_ref(anchor, positives, negatives)

    # Default tiling (single block per stream).
    loss = jax.block_until_ready(jax.jit(npair_loss)(anchor, positives, negatives))
    assert jnp.allclose(loss, ref, atol=1e-5, rtol=1e-5), (loss, ref)

    # Forced multi-tile path (exercises streaming, tail masking and the
    # two-"core" split of the combined tile list).
    loss_tiled = jax.block_until_ready(
        jax.jit(functools.partial(npair_loss, max_tile_rows=8))(
            anchor, positives, negatives))
    assert jnp.allclose(loss_tiled, ref, atol=1e-5, rtol=1e-5), (loss_tiled, ref)

    print("KERNEL_OK")
</pallas_src>

<mosaic_0001>
module attributes {stable_mosaic.version = 11 : i64} {
  func.func @_npair_kernel(%arg0: i32, %arg1: i32, %arg2: memref<32x1xf32, #tpu.memory_space<vmem>>, %arg3: memref<8x32xf32, #tpu.memory_space<vmem>>, %arg4: memref<12x32xf32, #tpu.memory_space<vmem>>, %arg5: memref<1x8x128xf32, #tpu.memory_space<vmem>>, %arg6: memref<1x8x128xf32, #tpu.memory_space<vmem>>, %arg7: memref<1x1xf32, #tpu.memory_space<vmem>>, %arg8: memref<1x1xf32, #tpu.memory_space<vmem>>, %arg9: memref<1x1xf32, #tpu.memory_space<vmem>>, %arg10: memref<1x1xf32, #tpu.memory_space<vmem>>) attributes {dimension_semantics = [#tpu.dimension_semantics<parallel>, #tpu.dimension_semantics<arbitrary>], iteration_bounds = array<i64: 2, 1>, scalar_prefetch = 0 : i64, scratch_operands = 4 : i64, tpu.core_type = #tpu.core_type<tc>, window_params = [{pipeline_mode = #tpu.pipeline_mode<synchronous>, transform_indices = @transform_0, window_bounds = array<i64: 32, 1>}, {transform_indices = @transform_1, window_bounds = array<i64: 8, 32>}, {transform_indices = @transform_2, window_bounds = array<i64: 12, 32>}, {transform_indices = @transform_3, window_bounds = array<i64: 1, 8, 128>}, {transform_indices = @transform_4, window_bounds = array<i64: 1, 8, 128>}]} {
    %c1_i32 = arith.constant 1 : i32
    %0 = arith.muli %arg0, %c1_i32 : i32
    %1 = arith.addi %0, %arg1 : i32
    %c0_i32 = arith.constant 0 : i32
    %2 = arith.cmpi eq, %arg1, %c0_i32 : i32
    %3 = arith.extui %2 : i1 to i32
    %c0_i32_0 = arith.constant 0 : i32
    %4 = arith.cmpi ne, %3, %c0_i32_0 : i32
    scf.if %4 {
      %cst = arith.constant 0xFF800000 : f32
      %17 = vector.broadcast %cst : f32 to vector<1x1xf32>
      %c0_8 = arith.constant 0 : index
      %c0_9 = arith.constant 0 : index
      %18 = vector.load %arg7[%c0_8, %c0_9] : memref<1x1xf32, #tpu.memory_space<vmem>>, vector<1x1xf32>
      tpu.vector_store %arg7[%c0_8, %c0_9], %17 {strides = array<i32>} : memref<1x1xf32, #tpu.memory_space<vmem>>, vector<1x1xf32>,
      %cst_10 = arith.constant 0.000000e+00 : f32
      %19 = vector.broadcast %cst_10 : f32 to vector<1x1xf32>
      %c0_11 = arith.constant 0 : index
      %c0_12 = arith.constant 0 : index
      %20 = vector.load %arg8[%c0_11, %c0_12] : memref<1x1xf32, #tpu.memory_space<vmem>>, vector<1x1xf32>
      tpu.vector_store %arg8[%c0_11, %c0_12], %19 {strides = array<i32>} : memref<1x1xf32, #tpu.memory_space<vmem>>, vector<1x1xf32>,
      %cst_13 = arith.constant 0xFF800000 : f32
      %21 = vector.broadcast %cst_13 : f32 to vector<1x1xf32>
      %c0_14 = arith.constant 0 : index
      %c0_15 = arith.constant 0 : index
      %22 = vector.load %arg9[%c0_14, %c0_15] : memref<1x1xf32, #tpu.memory_space<vmem>>, vector<1x1xf32>
      tpu.vector_store %arg9[%c0_14, %c0_15], %21 {strides = array<i32>} : memref<1x1xf32, #tpu.memory_space<vmem>>, vector<1x1xf32>,
      %cst_16 = arith.constant 0.000000e+00 : f32
      %23 = vector.broadcast %cst_16 : f32 to vector<1x1xf32>
      %c0_17 = arith.constant 0 : index
      %c0_18 = arith.constant 0 : index
      %24 = vector.load %arg10[%c0_17, %c0_18] : memref<1x1xf32, #tpu.memory_space<vmem>>, vector<1x1xf32>
      tpu.vector_store %arg10[%c0_17, %c0_18], %23 {strides = array<i32>} : memref<1x1xf32, #tpu.memory_space<vmem>>, vector<1x1xf32>,
    } else {
    }
    %c0 = arith.constant 0 : index
    %c0_1 = arith.constant 0 : index
    %5 = vector.load %arg2[%c0, %c0_1] : memref<32x1xf32, #tpu.memory_space<vmem>>, vector<32x1xf32>
    %c1_i32_2 = arith.constant 1 : i32
    %6 = arith.cmpi slt, %1, %c1_i32_2 : i32
    %7 = arith.extui %6 : i1 to i32
    %c0_i32_3 = arith.constant 0 : i32
    %8 = arith.cmpi ne, %7, %c0_i32_3 : i32
    scf.if %8 {
      %c0_8 = arith.constant 0 : index
      %c0_9 = arith.constant 0 : index
      %17 = vector.load %arg3[%c0_8, %c0_9] : memref<8x32xf32, #tpu.memory_space<vmem>>, vector<8x32xf32>
      %cst = arith.constant dense<0.000000e+00> : vector<8x1xf32>
      %18 = tpu.matmul %17, %5, %cst {dimension_numbers = #tpu.dot_dimension_numbers<[1], [0], [0], [1], [0, 0, 1, 1], [], []>} : vector<8x32xf32>, vector<32x1xf32>, vector<8x1xf32> -> vector<8x1xf32>
      %19 = vector.shape_cast %18 : vector<8x1xf32> to vector<1x8x1xf32>
      %cst_10 = arith.constant dense<0xFF800000> : vector<1xf32>
      %20 = vector.multi_reduction <maximumf>, %19, %cst_10 [1, 2] : vector<1x8x1xf32> to vector<1xf32>
      %21 = vector.shape_cast %20 : vector<1xf32> to vector<1x1x1xf32>
      %22 = vector.extract %21[0, 0, 0] : f32 from vector<1x1x1xf32>
      %c0_11 = arith.constant 0 : index
      %c0_12 = arith.constant 0 : index
      %23 = vector.load %arg7[%c0_11, %c0_12] : memref<1x1xf32, #tpu.memory_space<vmem>>, vector<1x1xf32>
      %24 = vector.broadcast %22 : f32 to vector<1x1xf32>
      %25 = arith.maximumf %23, %24 : vector<1x1xf32>
      %c0_13 = arith.constant 0 : index
      %c0_14 = arith.constant 0 : index
      %26 = vector.load %arg8[%c0_13, %c0_14] : memref<1x1xf32, #tpu.memory_space<vmem>>, vector<1x1xf32>
      %c0_15 = arith.constant 0 : index
      %c0_16 = arith.constant 0 : index
      %27 = vector.load %arg7[%c0_15, %c0_16] : memref<1x1xf32, #tpu.memory_space<vmem>>, vector<1x1xf32>
      %28 = arith.subf %27, %25 : vector<1x1xf32>
      %29 = math.exp %28 : vector<1x1xf32>
      %30 = arith.mulf %26, %29 : vector<1x1xf32>
      %31 = vector.broadcast %25 : vector<1x1xf32> to vector<8x1xf32>
      %32 = arith.subf %18, %31 : vector<8x1xf32>
      %33 = math.exp %32 : vector<8x1xf32>
      %34 = vector.shape_cast %33 : vector<8x1xf32> to vector<1x8x1xf32>
      %cst_17 = arith.constant dense<0.000000e+00> : vector<1xf32>
      %35 = vector.multi_reduction <add>, %34, %cst_17 [1, 2] : vector<1x8x1xf32> to vector<1xf32>
      %36 = vector.shape_cast %35 : vector<1xf32> to vector<1x1x1xf32>
      %37 = vector.extract %36[0, 0, 0] : f32 from vector<1x1x1xf32>
      %38 = vector.broadcast %37 : f32 to vector<1x1xf32>
      %39 = arith.addf %30, %38 : vector<1x1xf32>
      %c0_18 = arith.constant 0 : index
      %c0_19 = arith.constant 0 : index
      %40 = vector.load %arg8[%c0_18, %c0_19] : memref<1x1xf32, #tpu.memory_space<vmem>>, vector<1x1xf32>
      tpu.vector_store %arg8[%c0_18, %c0_19], %39 {strides = array<i32>} : memref<1x1xf32, #tpu.memory_space<vmem>>, vector<1x1xf32>,
      %c0_20 = arith.constant 0 : index
      %c0_21 = arith.constant 0 : index
      %41 = vector.load %arg7[%c0_20, %c0_21] : memref<1x1xf32, #tpu.memory_space<vmem>>, vector<1x1xf32>
      tpu.vector_store %arg7[%c0_20, %c0_21], %25 {strides = array<i32>} : memref<1x1xf32, #tpu.memory_space<vmem>>, vector<1x1xf32>,
    } else {
    }
    %c1_i32_4 = arith.constant 1 : i32
    %9 = arith.cmpi sge, %1, %c1_i32_4 : i32
    %c2_i32 = arith.constant 2 : i32
    %10 = arith.cmpi slt, %1, %c2_i32 : i32
    %11 = arith.andi %9, %10 : i1
    %12 = arith.extui %11 : i1 to i32
    %c0_i32_5 = arith.constant 0 : i32
    %13 = arith.cmpi ne, %12, %c0_i32_5 : i32
    scf.if %13 {
      %c0_8 = arith.constant 0 : index
      %c0_9 = arith.constant 0 : index
      %17 = vector.load %arg4[%c0_8, %c0_9] : memref<12x32xf32, #tpu.memory_space<vmem>>, vector<12x32xf32>
      %cst = arith.constant dense<0.000000e+00> : vector<12x1xf32>
      %18 = tpu.matmul %17, %5, %cst {dimension_numbers = #tpu.dot_dimension_numbers<[1], [0], [0], [1], [0, 0, 1, 1], [], []>} : vector<12x32xf32>, vector<32x1xf32>, vector<12x1xf32> -> vector<12x1xf32>
      %19 = vector.shape_cast %18 : vector<12x1xf32> to vector<1x12x1xf32>
      %cst_10 = arith.constant dense<0xFF800000> : vector<1xf32>
      %20 = vector.multi_reduction <maximumf>, %19, %cst_10 [1, 2] : vector<1x12x1xf32> to vector<1xf32>
      %21 = vector.shape_cast %20 : vector<1xf32> to vector<1x1x1xf32>
      %22 = vector.extract %21[0, 0, 0] : f32 from vector<1x1x1xf32>
      %c0_11 = arith.constant 0 : index
      %c0_12 = arith.constant 0 : index
      %23 = vector.load %arg9[%c0_11, %c0_12] : memref<1x1xf32, #tpu.memory_space<vmem>>, vector<1x1xf32>
      %24 = vector.broadcast %22 : f32 to vector<1x1xf32>
      %25 = arith.maximumf %23, %24 : vector<1x1xf32>
      %c0_13 = arith.constant 0 : index
      %c0_14 = arith.constant 0 : index
      %26 = vector.load %arg10[%c0_13, %c0_14] : memref<1x1xf32, #tpu.memory_space<vmem>>, vector<1x1xf32>
      %c0_15 = arith.constant 0 : index
      %c0_16 = arith.constant 0 : index
      %27 = vector.load %arg9[%c0_15, %c0_16] : memref<1x1xf32, #tpu.memory_space<vmem>>, vector<1x1xf32>
      %28 = arith.subf %27, %25 : vector<1x1xf32>
      %29 = math.exp %28 : vector<1x1xf32>
      %30 = arith.mulf %26, %29 : vector<1x1xf32>
      %31 = vector.broadcast %25 : vector<1x1xf32> to vector<12x1xf32>
      %32 = arith.subf %18, %31 : vector<12x1xf32>
      %33 = math.exp %32 : vector<12x1xf32>
      %34 = vector.shape_cast %33 : vector<12x1xf32> to vector<1x12x1xf32>
      %cst_17 = arith.constant dense<0.000000e+00> : vector<1xf32>
      %35 = vector.multi_reduction <add>, %34, %cst_17 [1, 2] : vector<1x12x1xf32> to vector<1xf32>
      %36 = vector.shape_cast %35 : vector<1xf32> to vector<1x1x1xf32>
      %37 = vector.extract %36[0, 0, 0] : f32 from vector<1x1x1xf32>
      %38 = vector.broadcast %37 : f32 to vector<1x1xf32>
      %39 = arith.addf %30, %38 : vector<1x1xf32>
      %c0_18 = arith.constant 0 : index
      %c0_19 = arith.constant 0 : index
      %40 = vector.load %arg10[%c0_18, %c0_19] : memref<1x1xf32, #tpu.memory_space<vmem>>, vector<1x1xf32>
      tpu.vector_store %arg10[%c0_18, %c0_19], %39 {strides = array<i32>} : memref<1x1xf32, #tpu.memory_space<vmem>>, vector<1x1xf32>,
      %c0_20 = arith.constant 0 : index
      %c0_21 = arith.constant 0 : index
      %41 = vector.load %arg9[%c0_20, %c0_21] : memref<1x1xf32, #tpu.memory_space<vmem>>, vector<1x1xf32>
      tpu.vector_store %arg9[%c0_20, %c0_21], %25 {strides = array<i32>} : memref<1x1xf32, #tpu.memory_space<vmem>>, vector<1x1xf32>,
    } else {
    }
    %c0_i32_6 = arith.constant 0 : i32
    %14 = arith.cmpi eq, %arg1, %c0_i32_6 : i32
    %15 = arith.extui %14 : i1 to i32
    %c0_i32_7 = arith.constant 0 : i32
    %16 = arith.cmpi ne, %15, %c0_i32_7 : i32
    scf.if %16 {
      %c0_8 = arith.constant 0 : index
      %c0_9 = arith.constant 0 : index
      %17 = vector.load %arg8[%c0_8, %c0_9] : memref<1x1xf32, #tpu.memory_space<vmem>>, vector<1x1xf32>
      %cst = arith.constant 0.000000e+00 : f32
      %18 = vector.broadcast %cst : f32 to vector<1x1xf32>
      %19 = arith.cmpf ogt, %17, %18 : vector<1x1xf32>
      %c0_10 = arith.constant 0 : index
      %c0_11 = arith.constant 0 : index
      %20 = vector.load %arg7[%c0_10, %c0_11] : memref<1x1xf32, #tpu.memory_space<vmem>>, vector<1x1xf32>
      %c0_12 = arith.constant 0 : index
      %c0_13 = arith.constant 0 : index
      %21 = vector.load %arg8[%c0_12, %c0_13] : memref<1x1xf32, #tpu.memory_space<vmem>>, vector<1x1xf32>
      %22 = math.log %21 : vector<1x1xf32>
      %23 = arith.addf %20, %22 : vector<1x1xf32>
      %cst_14 = arith.constant 0xFF800000 : f32
      %24 = vector.broadcast %cst_14 : f32 to vector<1x1xf32>
      %25 = arith.select %19, %23, %24 : vector<1x1xi1>, vector<1x1xf32>
      %c0_15 = arith.constant 0 : index
      %c0_16 = arith.constant 0 : index
      %26 = vector.load %arg10[%c0_15, %c0_16] : memref<1x1xf32, #tpu.memory_space<vmem>>, vector<1x1xf32>
      %cst_17 = arith.constant 0.000000e+00 : f32
      %27 = vector.broadcast %cst_17 : f32 to vector<1x1xf32>
      %28 = arith.cmpf ogt, %26, %27 : vector<1x1xf32>
      %c0_18 = arith.constant 0 : index
      %c0_19 = arith.constant 0 : index
      %29 = vector.load %arg9[%c0_18, %c0_19] : memref<1x1xf32, #tpu.memory_space<vmem>>, vector<1x1xf32>
      %c0_20 = arith.constant 0 : index
      %c0_21 = arith.constant 0 : index
      %30 = vector.load %arg10[%c0_20, %c0_21] : memref<1x1xf32, #tpu.memory_space<vmem>>, vector<1x1xf32>
      %31 = math.log %30 : vector<1x1xf32>
      %32 = arith.addf %29, %31 : vector<1x1xf32>
      %cst_22 = arith.constant 0xFF800000 : f32
      %33 = vector.broadcast %cst_22 : f32 to vector<1x1xf32>
      %34 = arith.select %28, %32, %33 : vector<1x1xi1>, vector<1x1xf32>
      %35 = vector.shape_cast %25 : vector<1x1xf32> to vector<1x1xf32>
      %36 = vector.broadcast %35 : vector<1x1xf32> to vector<8x128xf32>
      %c0_23 = arith.constant 0 : index
      %c0_24 = arith.constant 0 : index
      %c0_25 = arith.constant 0 : index
      %37 = vector.load %arg5[%c0_23, %c0_24, %c0_25] : memref<1x8x128xf32, #tpu.memory_space<vmem>>, vector<1x8x128xf32>
      %38 = vector.shape_cast %37 : vector<1x8x128xf32> to vector<8x128xf32>
      %39 = vector.shape_cast %36 : vector<8x128xf32> to vector<1x8x128xf32>
      tpu.vector_store %arg5[%c0_23, %c0_24, %c0_25], %39 {strides = array<i32>} : memref<1x8x128xf32, #tpu.memory_space<vmem>>, vector<1x8x128xf32>,
      %40 = vector.shape_cast %34 : vector<1x1xf32> to vector<1x1xf32>
      %41 = vector.broadcast %40 : vector<1x1xf32> to vector<8x128xf32>
      %c0_26 = arith.constant 0 : index
      %c0_27 = arith.constant 0 : index
      %c0_28 = arith.constant 0 : index
      %42 = vector.load %arg6[%c0_26, %c0_27, %c0_28] : memref<1x8x128xf32, #tpu.memory_space<vmem>>, vector<1x8x128xf32>
      %43 = vector.shape_cast %42 : vector<1x8x128xf32> to vector<8x128xf32>
      %44 = vector.shape_cast %41 : vector<8x128xf32> to vector<1x8x128xf32>
      tpu.vector_store %arg6[%c0_26, %c0_27, %c0_28], %44 {strides = array<i32>} : memref<1x8x128xf32, #tpu.memory_space<vmem>>, vector<1x8x128xf32>,
    } else {
    }
    return
  }
  func.func @transform_0(%arg0: i32, %arg1: i32) -> (i32, i32) {
    %c0_i32 = arith.constant 0 : i32
    %c0_i32_0 = arith.constant 0 : i32
    %c0_i32_1 = arith.constant 0 : i32
    return %c0_i32, %c0_i32_0 : i32, i32
  }
  func.func @transform_1(%arg0: i32, %arg1: i32) -> (i32, i32) {
    %c1_i32 = arith.constant 1 : i32
    %0 = arith.muli %arg0, %c1_i32 : i32
    %1 = arith.addi %0, %arg1 : i32
    %c0_i32 = arith.constant 0 : i32
    %c0_i32_0 = arith.constant 0 : i32
    %2 = arith.maxsi %c0_i32, %1 : i32
    %3 = arith.minsi %c0_i32_0, %2 : i32
    %c0_i32_1 = arith.constant 0 : i32
    %c0_i32_2 = arith.constant 0 : i32
    return %3, %c0_i32_1 : i32, i32
  }
  func.func @transform_2(%arg0: i32, %arg1: i32) -> (i32, i32) {
    %c1_i32 = arith.constant 1 : i32
    %0 = arith.muli %arg0, %c1_i32 : i32
    %1 = arith.addi %0, %arg1 : i32
    %c1_i32_0 = arith.constant 1 : i32
    %2 = arith.subi %1, %c1_i32_0 : i32
    %c0_i32 = arith.constant 0 : i32
    %c0_i32_1 = arith.constant 0 : i32
    %3 = arith.maxsi %c0_i32, %2 : i32
    %4 = arith.minsi %c0_i32_1, %3 : i32
    %c0_i32_2 = arith.constant 0 : i32
    %c0_i32_3 = arith.constant 0 : i32
    return %4, %c0_i32_2 : i32, i32
  }
  func.func @transform_3(%arg0: i32, %arg1: i32) -> (i32, i32, i32) {
    %c0_i32 = arith.constant 0 : i32
    %c0_i32_0 = arith.constant 0 : i32
    %c0_i32_1 = arith.constant 0 : i32
    return %arg0, %c0_i32, %c0_i32_0 : i32, i32, i32
  }
  func.func @transform_4(%arg0: i32, %arg1: i32) -> (i32, i32, i32) {
    %c0_i32 = arith.constant 0 : i32
    %c0_i32_0 = arith.constant 0 : i32
    %c0_i32_1 = arith.constant 0 : i32
    return %arg0, %c0_i32, %c0_i32_0 : i32, i32, i32
  }
}

</mosaic_0001>

<bundles_post_ra>
// kernel: npair_loss.1
= control target key start
LH: loop header
LB: loop body
LE: loop exit
PB: predicated region body
PF: predicated region fallthrough
CT: control target
= control target key end

     0   :  { %s921_s15 = smov 0   ;;  %s923_s16 = smov 0   ;;  %s1025_s0 = inlined_call_operand.vmem [shape: f32[32,1], index: 0, kind: input, shape index: {}]   ;;  %s1026_s1 = inlined_call_operand.vmem [shape: f32[8,32], index: 1, kind: input, shape index: {}]   ;;  %s1027_s2 = inlined_call_operand.vmem [shape: f32[12,32], index: 2, kind: input, shape index: {}]   ;;  %s1028_s3 = inlined_call_operand.vmem [shape: f32[2,8,128], index: 3, kind: output, shape index: {0}]   ;;  %s1029_s4 = inlined_call_operand.vmem [shape: f32[2,8,128], index: 4, kind: output, shape index: {1}]  }
   0x1   :  { %s925_s17 = smov 0  }
   0x2 LB: > { %s27_s18 = sadd.s32 1, %s885_s16  ;;  %p759_p0 = scmp.ge.s32.totalorder %s889_s17, 1  ;;  %s889_s17 = sphi %s925_s17, %s15_s17   ;;  %s885_s16 = sphi %s923_s16, %s1031_s16   ;;  %s881_s15 = sphi %s921_s15, %s1030_s15  }
   0x3   : > { %p29_p1 = scmp.ge.s32.totalorder %s27_s18, 2  ;;  %p231_p2 = scmp.lt.s32.totalorder %s889_s17, 3 }
   0x5   : > { %s1033_s18 = smov (%p29_p1, %s27_s18), 0  ;;  %p232_p3 = pnand %p759_p0, %p231_p2 }
   0x6   : > { %p307_p4 = scmp.lt.s32.totalorder (!%p232_p3), %s881_s15, 1  ;;  %p776_p5 = scmp.ge.s32.totalorder (!%p232_p3), %s881_s15, 1 }
   0x7   : > { %235 = sbr.rel (%p232_p3) target bundleno = 1449 (0x5a9), region = 32 }
   0xc   : > { %vm320_vm0 = vcmask 0   ;;  %v945_v0 = vld [vmem:[%s1025_s0] sm:$0xff]  ;;  %v950_v1 = vld [vmem:[%s1025_s0 + $0x8] sm:$0xff]  ;;  %v891_v2 = vmov -inf   ;;  %v892_v3 = vmov 0.0   ;;  %v959_v4 = vld [vmem:[%s1025_s0 + $0x10] sm:$0xff] }
   0xd   : > { %321 = vst.msk [vmem:[#allocation2] sm:$0x1] %vm320_vm0, %v891_v2  ;;  %323 = vst.msk [vmem:[#allocation4] sm:$0x1] %vm320_vm0, %v891_v2  ;;  %v964_v5 = vld [vmem:[%s1025_s0 + $0x18] sm:$0xff]  ;;  %s308_s27 = scalar_select %p307_p4, %s881_s15, 1 }
   0xe   : > { %322 = vst.msk [vmem:[#allocation3] sm:$0x1] %vm320_vm0, %v892_v3  ;;  %324 = vst.msk [vmem:[#allocation5] sm:$0x1] %vm320_vm0, %v892_v3  ;;  %332 = sbr.rel (%p776_p5) target bundleno = 650 (0x28a), region = 40 }
   0xf   : > { %s774_s28 = sshll.u32 %s308_s27, 3 }
  0x10   : > { %s970_s5 = scalar_lea.vmem %s1028_s3, %s774_s28  ;;  %s975_s8 = scalar_lea.vmem %s1029_s4, %s774_s28 }
  0x13   : > { %v893_v6 = vmov 0.0   ;;  %vm894_vm1 = vmmov 0   ;;  %v333_v7 = vld [vmem:[%s1026_s1] sm:$0xff]  ;;  %vm334_vm2 = vcmask 261120   ;;  %vm408_vm3 = vcmask 7168  }
  0x14   : > { %793 = vmatprep.subr.mxu0 %v893_v6  ;;  %801 = vmatprep.mubr.msk.f32.mxu0 %vm894_vm1, %v893_v6  ;;  %v428_v18 = vlaneseq  ;;  %v419_v20 = vld [vmem:[#allocation2] sm:$0x1] }
  0x15   : > { %794 = vmatpush3.msra.mxu0 %v964_v5  ;;  %v422_v39 = vld [vmem:[#allocation3] sm:$0x1] }
  0x16   : > { %795 = vmatprep.subr.mxu0 %v893_v6  ;;  %v429_v19 = vshrl.u32 %v428_v18, 7 }
  0x17   : > { %796 = vmatpush3.msra.mxu0 %v959_v4 }
  0x18   : > { %797 = vmatprep.subr.mxu0 %v893_v6  ;;  %v430_v21 = vsub.s32 0, %v429_v19 }
  0x19   : > { %798 = vmatpush3.msra.mxu0 %v950_v1 }
  0x1a   : > { %799 = vmatprep.subr.mxu0 %v893_v6 }
  0x1b   : > { %800 = vmatpush3.msra.mxu0 %v945_v0 }
  0x1c   : > { %802 = vmatmul.mubr.msk.f32.vlgmr.msra.gmra.mxu0 %vm334_vm2, %v333_v7 }
  0xdc   : > { %v404_v8 = vpop.f32.mrf.mxu0 }
  0xdd   : > { %v409_v9 = vsel %vm408_vm3, %v404_v8, -inf }
  0xde   : > { %410 = vmax.xlane.f32.xlu0 %v409_v9  ;;  %v803_v10 = vpop.f32.mrf.mxu0 }
 0x167   : > { %v411_v11 = vpop.xlane.xlu0 %410 }
 0x168   : > { %v412_v12 = vrot.slane %v411_v11, 4 }
 0x16a   : > { %v413_v13 = vmax.f32 %v411_v11, %v412_v12 }
 0x16c   : > { %v414_v14 = vrot.slane %v413_v13, 2 }
 0x16e   : > { %v415_v15 = vmax.f32 %v413_v13, %v414_v14 }
 0x170   : > { %v416_v16 = vrot.slane %v415_v15, 1 }
 0x172   : > { %v417_v17 = vmax.f32 %v415_v15, %v416_v16 }
 0x174   : > { %815 = vpush %v417_v17 }
 0x1a5   : > { %s816_s11 = spop %815 }
 0x1a6   : > { %v420_v22 = vstv %s816_s11 }
 0x1a7   : > { %v421_v23 = vmax.f32 %v419_v20, %v420_v22 }
 0x1a9   : > { %v423_v24 = vsub.f32 %v419_v20, %v421_v23  ;;  %v431_v25 = vrot.slane %v421_v23, %v430_v21  ;;  %450 = vst.msk [vmem:[#allocation2] sm:$0x1] %vm320_vm0, %v421_v23 }
 0x1ab   : > { %v433_v26 = vsub.f32 %v404_v8, %v431_v25  ;;  %v424_v37 = vmul.f32 1.442695, %v423_v24 }
 0x1ad   : > { %v434_v27 = vmul.f32 1.442695, %v433_v26 }
 0x1af   : > { %852 = vpow2.f32 %v434_v27 }
 0x1b0   : > { %854 = vpow2.f32 %v424_v37 }
 0x1bc   : > { %v853_v28 = vpop.eup %852 }
 0x1bd   : > { %v436_v29 = vsel %vm408_vm3, %v853_v28, 0.0  ;;  %v855_v38 = vpop.eup %854 }
 0x1be   : > { %437 = vadd.xlane.f32.xlu0 %v436_v29  ;;  %v426_v40 = vmul.f32 %v855_v38, %v422_v39 }
 0x247   : > { %v438_v30 = vpop.xlane.xlu0 %437 }
 0x248   : > { %v439_v31 = vrot.slane %v438_v30, 4 }
 0x24a   : > { %v440_v32 = vadd.f32 %v439_v31, %v438_v30 }
 0x24c   : > { %v441_v33 = vrot.slane %v440_v32, 2 }
 0x24e   : > { %v442_v34 = vadd.f32 %v441_v33, %v440_v32 }
 0x250   : > { %v443_v35 = vrot.slane %v442_v34, 1 }
 0x252   : > { %v444_v36 = vadd.f32 %v443_v35, %v442_v34 }
 0x254   : > { %817 = vpush %v444_v36 }
 0x285   : > { %s818_s12 = spop %817 }
 0x286   : > { %v446_v41 = vstv %s818_s12 }
 0x287   : > { %v447_v42 = vadd.f32 %v446_v41, %v426_v40 }
 0x289   : > { %449 = vst.msk [vmem:[#allocation3] sm:$0x1] %vm320_vm0, %v447_v42 }
 0x28a PF: > { %p452_p6 = scmp.lt.s32.totalorder %s881_s15, 2 }
 0x28c   : > { %p453_p7 = pnand %p776_p5, %p452_p6 }
 0x28e   : > { %456 = sbr.rel (%p453_p7) target bundleno = 1296 (0x510), region = 44 }
 0x293   : > { %804 = vmatprep.subr.mxu0 %v964_v5  ;;  %v457_v43 = vld [vmem:[%s1027_s2] sm:$0xff]  ;;  %vm459_vm4 = vcmask 261120   ;;  %v458_v44 = vld [vmem:[%s1027_s2 + $0x8] sm:$0xf]  ;;  %vm541_vm5 = vcmask 7168   ;;  %vm543_vm6 = vcmask 3072   ;;  %v564_v57 = vlaneseq }
 0x294   : > { %805 = vmatpush3.msra.mxu0 %v964_v5  ;;  %812 = vmatprep.mubr.msk.f32.mxu0 %vm459_vm4, %v457_v43  ;;  %v555_v59 = vld [vmem:[#allocation4] sm:$0x1]  ;;  %v558_v19 = vld [vmem:[#allocation5] sm:$0x1] }
 0x295   : > { %806 = vmatprep.subr.mxu0 %v959_v4  ;;  %v565_v58 = vshrl.u32 %v564_v57, 7 }
 0x296   : > { %807 = vmatpush3.msra.mxu0 %v959_v4 }
 0x297   : > { %808 = vmatprep.subr.mxu0 %v950_v1  ;;  %v566_v60 = vsub.s32 0, %v565_v58 }
 0x298   : > { %809 = vmatpush3.msra.mxu0 %v950_v1 }
 0x299   : > { %810 = vmatprep.subr.mxu0 %v945_v0 }
 0x29a   : > { %811 = vmatpush3.msra.mxu0 %v945_v0 }
 0x29b   : > { %813 = vmatmul.mubr.msk.f32.vlgmr.msra.gmra.mxu0 %vm459_vm4, %v458_v44 }
 0x35b   : > { %v814_v45 = vpop.f32.mrf.mxu0 }
 0x35c   : > { %v544_v48 = vsel %vm543_vm6, %v814_v45, -inf }
 0x35d   : > { %v532_v46 = vpop.f32.mrf.mxu0 }
 0x35e   : > { %v542_v47 = vsel %vm541_vm5, %v532_v46, -inf }
 0x35f   : > { %v545_v49 = vmax.f32 %v542_v47, %v544_v48 }
 0x361   : > { %546 = vmax.xlane.f32.xlu0 %v545_v49 }
 0x3ea   : > { %v547_v50 = vpop.xlane.xlu0 %546 }
 0x3eb   : > { %v548_v51 = vrot.slane %v547_v50, 4 }
 0x3ed   : > { %v549_v52 = vmax.f32 %v547_v50, %v548_v51 }
 0x3ef   : > { %v550_v53 = vrot.slane %v549_v52, 2 }
 0x3f1   : > { %v551_v54 = vmax.f32 %v549_v52, %v550_v53 }
 0x3f3   : > { %v552_v55 = vrot.slane %v551_v54, 1 }
 0x3f5   : > { %v553_v56 = vmax.f32 %v551_v54, %v552_v55 }
 0x3f7   : > { %819 = vpush %v553_v56 }
 0x428   : > { %s820_s20 = spop %819 }
 0x429   : > { %v556_v61 = vstv %s820_s20 }
 0x42a   : > { %v557_v62 = vmax.f32 %v555_v59, %v556_v61 }
 0x42c   : > { %v559_v63 = vsub.f32 %v555_v59, %v557_v62  ;;  %v567_v0 = vrot.slane %v557_v62, %v566_v60  ;;  %591 = vst.msk [vmem:[#allocation4] sm:$0x1] %vm320_vm0, %v557_v62 }
 0x42e   : > { %v569_v1 = vsub.f32 %v532_v46, %v567_v0  ;;  %v570_v2 = vsub.f32 %v814_v45, %v567_v0  ;;  %v560_v17 = vmul.f32 1.442695, %v559_v63 }
 0x430   : > { %v571_v3 = vmul.f32 1.442695, %v569_v1  ;;  %v573_v4 = vmul.f32 1.442695, %v570_v2 }
 0x432   : > { %856 = vpow2.f32 %v571_v3 }
 0x433   : > { %858 = vpow2.f32 %v573_v4 }
 0x434   : > { %860 = vpow2.f32 %v560_v17 }
 0x43f   : > { %v857_v5 = vpop.eup %856 }
 0x440   : > { %v859_v6 = vpop.eup %858  ;;  %v575_v7 = vsel %vm541_vm5, %v857_v5, 0.0 }
 0x441   : > { %v576_v8 = vsel %vm543_vm6, %v859_v6, 0.0  ;;  %v861_v18 = vpop.eup %860 }
 0x442   : > { %v577_v9 = vadd.f32 %v576_v8, %v575_v7  ;;  %v562_v20 = vmul.f32 %v861_v18, %v558_v19 }
 0x444   : > { %578 = vadd.xlane.f32.xlu0 %v577_v9 }
 0x4cd   : > { %v579_v10 = vpop.xlane.xlu0 %578 }
 0x4ce   : > { %v580_v11 = vrot.slane %v579_v10, 4 }
 0x4d0   : > { %v581_v12 = vadd.f32 %v580_v11, %v579_v10 }
 0x4d2   : > { %v582_v13 = vrot.slane %v581_v12, 2 }
 0x4d4   : > { %v583_v14 = vadd.f32 %v582_v13, %v581_v12 }
 0x4d6   : > { %v584_v15 = vrot.slane %v583_v14, 1 }
 0x4d8   : > { %v585_v16 = vadd.f32 %v584_v15, %v583_v14 }
 0x4da   : > { %821 = vpush %v585_v16 }
 0x50b   : > { %s822_s21 = spop %821 }
 0x50c   : > { %v587_v21 = vstv %s822_s21 }
 0x50d   : > { %v588_v22 = vadd.f32 %v587_v21, %v562_v20 }
 0x50f   : > { %590 = vst.msk [vmem:[#allocation5] sm:$0x1] %vm320_vm0, %v588_v22 }
 0x510 PF: > { %v595_v23 = vld [vmem:[#allocation3] sm:$0x1]  ;;  %v895_v24 = vmov 0   ;;  %v610_v26 = vlaneseq  ;;  %v597_v29 = vld [vmem:[#allocation2] sm:$0x1] }
 0x511   : > { %862 = vset.pattern.permute.xlu0 %v895_v24  ;;  %863 = vlog2.f32 %v595_v23  ;;  %v604_v32 = vld [vmem:[#allocation4] sm:$0x1]  ;;  %vm596_vm7 = vcmp.gt.f32.partialorder %v595_v23, 0.0 }
 0x512   : > { %v611_v27 = vshrl.u32 %v610_v26, 7 }
 0x514   : > { %v612_v33 = vsub.s32 0, %v611_v27 }
 0x516   : > { %v602_v25 = vld [vmem:[#allocation5] sm:$0x1] }
 0x517   : > { %865 = vlog2.f32 %v602_v25  ;;  %vm603_vm8 = vcmp.gt.f32.partialorder %v602_v25, 0.0 }
 0x51e   : > { %v864_v28 = vpop.eup %863 }
 0x51f   : > { %v599_v31 = vmul.f32 0.6931472, %v864_v28 }
 0x521   : > { %v600_v35 = vadd.f32 %v599_v31, %v597_v29 }
 0x523   : > { %v601_v37 = vsel %vm596_vm7, %v600_v35, -inf }
 0x524   : > { %v866_v30 = vpop.eup %865  ;;  %v613_v38 = vrot.slane %v601_v37, %v612_v33 }
 0x525   : > { %v606_v34 = vmul.f32 0.6931472, %v866_v30 }
 0x526   : > { %615 = vperm.xlu0 %862, %v613_v38  }
 0x527   : > { %v607_v36 = vadd.f32 %v606_v34, %v604_v32 }
 0x529   : > { %v608_v39 = vsel %vm603_vm8, %v607_v36, -inf }
 0x52a   : > { %v623_v40 = vrot.slane %v608_v39, %v612_v33 }
 0x52c   : > { %625 = vperm.xlu0 %862, %v623_v40  }
 0x5a1   : > { %v616_v41 = vpop.permute.xlu0 %615 }
 0x5a2   : > { %618 = vst [vmem:[%s970_s5] sm:$0xff] %v616_v41 }
 0x5a7   : > { %v626_v42 = vpop.permute.xlu0 %625 }
 0x5a8   : > { %628 = vst [vmem:[%s975_s8] sm:$0xff] %v626_v42 }
 0x5a9 PF: > { %s15_s17 = sadd.s32 1, %s889_s17   ;;  %s1030_s15 = smov %s885_s16 }
 0x5aa   : > { %p12_p8 = scmp.ge.s32.totalorder %s15_s17, 4   ;;  %s1031_s16 = smov %s1033_s18 }
 0x5ac   :  { %14 = sbr.rel (!%p12_p8) target bundleno = 2 (0x2), region = 93 }

</bundles_post_ra>
